<compile_context>
chip_gen: v7x
topology: tpu7x:2x2x1
jax: 0.10.0
libtpu: 0.0.40
codegen_flags: <defaults>
</compile_context>

<pallas_src>
import jax
import jax.numpy as jnp
from jax.experimental import pallas as pl
from jax.experimental.pallas import tpu as pltpu


def _round_up(x, m):
    return -(-x // m) * m


def _generation_params():
    """(target_tile_bytes, vmem_limit_bytes, min_grid_steps) per TPU generation."""
    try:
        vmem_cap = pltpu.get_tpu_info().vmem_capacity_bytes
    except Exception:
        vmem_cap = 64 * 1024 * 1024  # conservative (v7x-like) default
    if vmem_cap >= 128 * 1024 * 1024:
        # v5e / v6e: 128 MiB physical VMEM, single TensorCore -> bigger tiles.
        return 4 * 1024 * 1024, 64 * 1024 * 1024, 4
    # v7x-like: 64 MiB VMEM per TC, 2 TCs -> keep both busy with >= 8 steps.
    return 2 * 1024 * 1024, 32 * 1024 * 1024, 8


def _pick_tile(dim, unit, bytes_per_unit1, target_bytes, batch, min_steps):
    """Largest tile along `dim` that is a multiple of `unit` (or the full dim),
    fits `target_bytes` (bytes_per_unit1 = bytes for a size-1 slice along dim),
    and is shrunk only as needed so the grid has >= min_steps steps. Tiles need
    NOT divide `dim`; the partial final block is handled by Pallas masking."""
    if dim <= unit:
        return dim
    tile = (target_bytes // max(bytes_per_unit1, 1)) // unit * unit
    tile = max(unit, min(tile, _round_up(dim, unit)))
    num = -(-dim // tile)
    if num * batch < min_steps:
        want = max(1, min(-(-min_steps // batch), dim // unit))
        if want > num:
            tile = max(unit, _round_up(-(-dim // want), unit))
    return dim if tile >= dim else tile


def _ctrelu_kernel(x_ref, t_ref, o_ref):
    """x_ref, t_ref, o_ref blocks share a leading K axis:
         aligned path: (K, Rt, lane); ragged path: (K, Nt).
    Explicit unrolled K-accumulate in f32; masked output written per k."""
    K = x_ref.shape[0]
    acc = x_ref[0].astype(jnp.float32) * t_ref[0].astype(jnp.float32)
    for k in range(1, K):
        acc = acc + x_ref[k].astype(jnp.float32) * t_ref[k].astype(jnp.float32)
    keep = acc >= 0.0
    for k in range(K):
        xk = x_ref[k]
        o_ref[k] = jnp.where(keep, xk, 0.0).astype(o_ref.dtype)


@jax.jit
def ctrelu_forward(x, t):
    """Forward of ctReLU. x: [B, K, C, H, W]; t: [K, C, H, W] -> same shape as x."""
    B, K, C, H, W = x.shape
    assert t.shape == (K, C, H, W)
    N = C * H * W

    target_bytes, vmem_limit, min_steps = _generation_params()
    itemsize = x.dtype.itemsize

    x3 = x.reshape(B, K, N)  # metadata-only reshapes (contiguous)
    t2 = t.reshape(K, N)

    lane = next((l for l in (512, 256, 128) if N % l == 0), None)

    if lane is not None:
        # ---- lane-aligned path: view as [B, K, R, lane], tile rows R ----
        R = N // lane
        x4 = x3.reshape(B, K, R, lane)
        t3 = t2.reshape(K, R, lane)

        Rt = _pick_tile(R, 8, K * lane * itemsize, target_bytes, B, min_steps)
        num_r = pl.cdiv(R, Rt)

        out = pl.pallas_call(
            _ctrelu_kernel,
            out_shape=jax.ShapeDtypeStruct((B, K, R, lane), x.dtype),
            grid_spec=pltpu.PrefetchScalarGridSpec(
                num_scalar_prefetch=0,
                # Row-tile axis OUTER, batch INNER: t block index is unchanged
                # across the inner batch loop -> t DMA issued once per row tile.
                grid=(num_r, B),
                in_specs=[
                    pl.BlockSpec((pl.Squeezed(), K, Rt, lane),
                                 lambda r, b: (b, 0, r, 0)),
                    pl.BlockSpec((K, Rt, lane),
                                 lambda r, b: (0, r, 0)),
                ],
                out_specs=pl.BlockSpec((pl.Squeezed(), K, Rt, lane),
                                       lambda r, b: (b, 0, r, 0)),
            ),
            compiler_params=pltpu.CompilerParams(
                dimension_semantics=("parallel", "parallel"),
                vmem_limit_bytes=vmem_limit,
            ),
        )(x4, t3)
        return out.reshape(B, K, C, H, W)

    # ---- ragged path: no multiple of 128 divides N -> tile flat N directly;
    # the partial final block is masked by Pallas (no pad, no output slice). ----
    Nt = _pick_tile(N, 128, _round_up(K, 8) * itemsize, target_bytes, B, min_steps)
    num_n = pl.cdiv(N, Nt)

    out = pl.pallas_call(
        _ctrelu_kernel,
        out_shape=jax.ShapeDtypeStruct((B, K, N), x.dtype),
        grid_spec=pltpu.PrefetchScalarGridSpec(
            num_scalar_prefetch=0,
            grid=(num_n, B),
            in_specs=[
                pl.BlockSpec((pl.Squeezed(), K, Nt), lambda n, b: (b, 0, n)),
                pl.BlockSpec((K, Nt), lambda n, b: (0, n)),
            ],
            out_specs=pl.BlockSpec((pl.Squeezed(), K, Nt), lambda n, b: (b, 0, n)),
        ),
        compiler_params=pltpu.CompilerParams(
            dimension_semantics=("parallel", "parallel"),
            vmem_limit_bytes=vmem_limit,
        ),
    )(x3, t2)
    return out.reshape(B, K, C, H, W)


def make_t(key, category_dim, num_channels, height, width, share_t=True):
    """Deterministic construction of the +/-1 `t` parameter (matches __init__)."""
    t = jnp.zeros((category_dim, num_channels, height, width), jnp.float32)
    if share_t:
        t_half = (
            jax.random.randint(key, (category_dim, num_channels // 2), 0, 2)
            .astype(jnp.float32) * 2.0 - 1.0
        )
        t = t.at[:, ::2, :, :].set(t_half[:, :, None, None])
        t = t.at[:, 1::2, :, :].set(-t_half[:, :, None, None])
    else:
        t_half = (
            jax.random.randint(
                key, (category_dim, num_channels // 2, height, width), 0, 2
            ).astype(jnp.float32) * 2.0 - 1.0
        )
        t = t.at[:, ::2, :, :].set(t_half)
        t = t.at[:, 1::2, :, :].set(-t_half)
    return t


def ctrelu_reference(x, t):
    to_thresh = jnp.sum(x * t[None], axis=1)
    mask = (to_thresh >= 0).astype(x.dtype)
    return x * mask[:, None]


if __name__ == "__main__":
    key = jax.random.PRNGKey(0)
    k_t, k_x, k_t2, k_x2 = jax.random.split(key, 4)

    # Lane-aligned path: C*H*W = 1024 is a multiple of 512.
    B, K, C, H, W = 2, 4, 4, 16, 16
    t = make_t(k_t, K, C, H, W, share_t=True)
    x = jax.random.normal(k_x, (B, K, C, H, W), jnp.float32)

    out = jax.block_until_ready(ctrelu_forward(x, t))
    ref = ctrelu_reference(x, t)
    assert out.shape == (B, K, C, H, W)
    assert jnp.allclose(out, ref, atol=1e-6, rtol=1e-6), "mismatch (aligned path)"

    # Ragged path: C*H*W = 286, not a multiple of 128 -> tiled in 256-lane
    # chunks with a masked partial final block (no wrapper pad / slice).
    B2, K2, C2, H2, W2 = 1, 4, 2, 13, 11
    t_r = make_t(k_t2, K2, C2, H2, W2, share_t=False)
    x_r = jax.random.normal(k_x2, (B2, K2, C2, H2, W2), jnp.float32)

    out_r = jax.block_until_ready(ctrelu_forward(x_r, t_r))
    ref_r = ctrelu_reference(x_r, t_r)
    assert out_r.shape == (B2, K2, C2, H2, W2)
    assert jnp.allclose(out_r, ref_r, atol=1e-6, rtol=1e-6), "mismatch (ragged path)"

    print("KERNEL_OK")
</pallas_src>

<mosaic_0001>
module attributes {stable_mosaic.version = 11 : i64} {
  func.func @_ctrelu_kernel(%arg0: i32, %arg1: i32, %arg2: memref<1x4x2x512xf32, #tpu.memory_space<vmem>>, %arg3: memref<4x2x512xf32, #tpu.memory_space<vmem>>, %arg4: memref<1x4x2x512xf32, #tpu.memory_space<vmem>>) attributes {dimension_semantics = [#tpu.dimension_semantics<parallel>, #tpu.dimension_semantics<parallel>], iteration_bounds = array<i64: 1, 2>, scalar_prefetch = 0 : i64, scratch_operands = 0 : i64, tpu.core_type = #tpu.core_type<tc>, window_params = [{transform_indices = @transform_0, window_bounds = array<i64: 1, 4, 2, 512>}, {transform_indices = @transform_1, window_bounds = array<i64: 4, 2, 512>}, {transform_indices = @transform_2, window_bounds = array<i64: 1, 4, 2, 512>}]} {
    %c0 = arith.constant 0 : index
    %c0_0 = arith.constant 0 : index
    %c0_1 = arith.constant 0 : index
    %c0_2 = arith.constant 0 : index
    %0 = vector.load %arg2[%c0, %c0_0, %c0_1, %c0_2] : memref<1x4x2x512xf32, #tpu.memory_space<vmem>>, vector<1x1x2x512xf32>
    %1 = vector.shape_cast %0 : vector<1x1x2x512xf32> to vector<2x512xf32>
    %c0_3 = arith.constant 0 : index
    %c0_4 = arith.constant 0 : index
    %c0_5 = arith.constant 0 : index
    %2 = vector.load %arg3[%c0_3, %c0_4, %c0_5] : memref<4x2x512xf32, #tpu.memory_space<vmem>>, vector<1x2x512xf32>
    %3 = vector.shape_cast %2 : vector<1x2x512xf32> to vector<2x512xf32>
    %4 = arith.mulf %1, %3 : vector<2x512xf32>
    %c0_6 = arith.constant 0 : index
    %c1 = arith.constant 1 : index
    %c0_7 = arith.constant 0 : index
    %c0_8 = arith.constant 0 : index
    %5 = vector.load %arg2[%c0_6, %c1, %c0_7, %c0_8] : memref<1x4x2x512xf32, #tpu.memory_space<vmem>>, vector<1x1x2x512xf32>
    %6 = vector.shape_cast %5 : vector<1x1x2x512xf32> to vector<2x512xf32>
    %c1_9 = arith.constant 1 : index
    %c0_10 = arith.constant 0 : index
    %c0_11 = arith.constant 0 : index
    %7 = vector.load %arg3[%c1_9, %c0_10, %c0_11] : memref<4x2x512xf32, #tpu.memory_space<vmem>>, vector<1x2x512xf32>
    %8 = vector.shape_cast %7 : vector<1x2x512xf32> to vector<2x512xf32>
    %9 = arith.mulf %6, %8 : vector<2x512xf32>
    %10 = arith.addf %4, %9 : vector<2x512xf32>
    %c0_12 = arith.constant 0 : index
    %c2 = arith.constant 2 : index
    %c0_13 = arith.constant 0 : index
    %c0_14 = arith.constant 0 : index
    %11 = vector.load %arg2[%c0_12, %c2, %c0_13, %c0_14] : memref<1x4x2x512xf32, #tpu.memory_space<vmem>>, vector<1x1x2x512xf32>
    %12 = vector.shape_cast %11 : vector<1x1x2x512xf32> to vector<2x512xf32>
    %c2_15 = arith.constant 2 : index
    %c0_16 = arith.constant 0 : index
    %c0_17 = arith.constant 0 : index
    %13 = vector.load %arg3[%c2_15, %c0_16, %c0_17] : memref<4x2x512xf32, #tpu.memory_space<vmem>>, vector<1x2x512xf32>
    %14 = vector.shape_cast %13 : vector<1x2x512xf32> to vector<2x512xf32>
    %15 = arith.mulf %12, %14 : vector<2x512xf32>
    %16 = arith.addf %10, %15 : vector<2x512xf32>
    %c0_18 = arith.constant 0 : index
    %c3 = arith.constant 3 : index
    %c0_19 = arith.constant 0 : index
    %c0_20 = arith.constant 0 : index
    %17 = vector.load %arg2[%c0_18, %c3, %c0_19, %c0_20] : memref<1x4x2x512xf32, #tpu.memory_space<vmem>>, vector<1x1x2x512xf32>
    %18 = vector.shape_cast %17 : vector<1x1x2x512xf32> to vector<2x512xf32>
    %c3_21 = arith.constant 3 : index
    %c0_22 = arith.constant 0 : index
    %c0_23 = arith.constant 0 : index
    %19 = vector.load %arg3[%c3_21, %c0_22, %c0_23] : memref<4x2x512xf32, #tpu.memory_space<vmem>>, vector<1x2x512xf32>
    %20 = vector.shape_cast %19 : vector<1x2x512xf32> to vector<2x512xf32>
    %21 = arith.mulf %18, %20 : vector<2x512xf32>
    %22 = arith.addf %16, %21 : vector<2x512xf32>
    %cst = arith.constant 0.000000e+00 : f32
    %23 = vector.broadcast %cst : f32 to vector<2x512xf32>
    %24 = arith.cmpf oge, %22, %23 : vector<2x512xf32>
    %c0_24 = arith.constant 0 : index
    %c0_25 = arith.constant 0 : index
    %c0_26 = arith.constant 0 : index
    %c0_27 = arith.constant 0 : index
    %25 = vector.load %arg2[%c0_24, %c0_25, %c0_26, %c0_27] : memref<1x4x2x512xf32, #tpu.memory_space<vmem>>, vector<1x1x2x512xf32>
    %26 = vector.shape_cast %25 : vector<1x1x2x512xf32> to vector<2x512xf32>
    %cst_28 = arith.constant 0.000000e+00 : f32
    %27 = vector.broadcast %cst_28 : f32 to vector<2x512xf32>
    %28 = arith.select %24, %26, %27 : vector<2x512xi1>, vector<2x512xf32>
    %c0_29 = arith.constant 0 : index
    %c0_30 = arith.constant 0 : index
    %c0_31 = arith.constant 0 : index
    %c0_32 = arith.constant 0 : index
    %29 = vector.load %arg4[%c0_29, %c0_30, %c0_31, %c0_32] : memref<1x4x2x512xf32, #tpu.memory_space<vmem>>, vector<1x1x2x512xf32>
    %30 = vector.shape_cast %29 : vector<1x1x2x512xf32> to vector<2x512xf32>
    %31 = vector.shape_cast %28 : vector<2x512xf32> to vector<1x1x2x512xf32>
    tpu.vector_store %arg4[%c0_29, %c0_30, %c0_31, %c0_32], %31 {strides = array<i32>} : memref<1x4x2x512xf32, #tpu.memory_space<vmem>>, vector<1x1x2x512xf32>,
    %c0_33 = arith.constant 0 : index
    %c1_34 = arith.constant 1 : index
    %c0_35 = arith.constant 0 : index
    %c0_36 = arith.constant 0 : index
    %32 = vector.load %arg2[%c0_33, %c1_34, %c0_35, %c0_36] : memref<1x4x2x512xf32, #tpu.memory_space<vmem>>, vector<1x1x2x512xf32>
    %33 = vector.shape_cast %32 : vector<1x1x2x512xf32> to vector<2x512xf32>
    %cst_37 = arith.constant 0.000000e+00 : f32
    %34 = vector.broadcast %cst_37 : f32 to vector<2x512xf32>
    %35 = arith.select %24, %33, %34 : vector<2x512xi1>, vector<2x512xf32>
    %c0_38 = arith.constant 0 : index
    %c1_39 = arith.constant 1 : index
    %c0_40 = arith.constant 0 : index
    %c0_41 = arith.constant 0 : index
    %36 = vector.load %arg4[%c0_38, %c1_39, %c0_40, %c0_41] : memref<1x4x2x512xf32, #tpu.memory_space<vmem>>, vector<1x1x2x512xf32>
    %37 = vector.shape_cast %36 : vector<1x1x2x512xf32> to vector<2x512xf32>
    %38 = vector.shape_cast %35 : vector<2x512xf32> to vector<1x1x2x512xf32>
    tpu.vector_store %arg4[%c0_38, %c1_39, %c0_40, %c0_41], %38 {strides = array<i32>} : memref<1x4x2x512xf32, #tpu.memory_space<vmem>>, vector<1x1x2x512xf32>,
    %c0_42 = arith.constant 0 : index
    %c2_43 = arith.constant 2 : index
    %c0_44 = arith.constant 0 : index
    %c0_45 = arith.constant 0 : index
    %39 = vector.load %arg2[%c0_42, %c2_43, %c0_44, %c0_45] : memref<1x4x2x512xf32, #tpu.memory_space<vmem>>, vector<1x1x2x512xf32>
    %40 = vector.shape_cast %39 : vector<1x1x2x512xf32> to vector<2x512xf32>
    %cst_46 = arith.constant 0.000000e+00 : f32
    %41 = vector.broadcast %cst_46 : f32 to vector<2x512xf32>
    %42 = arith.select %24, %40, %41 : vector<2x512xi1>, vector<2x512xf32>
    %c0_47 = arith.constant 0 : index
    %c2_48 = arith.constant 2 : index
    %c0_49 = arith.constant 0 : index
    %c0_50 = arith.constant 0 : index
    %43 = vector.load %arg4[%c0_47, %c2_48, %c0_49, %c0_50] : memref<1x4x2x512xf32, #tpu.memory_space<vmem>>, vector<1x1x2x512xf32>
    %44 = vector.shape_cast %43 : vector<1x1x2x512xf32> to vector<2x512xf32>
    %45 = vector.shape_cast %42 : vector<2x512xf32> to vector<1x1x2x512xf32>
    tpu.vector_store %arg4[%c0_47, %c2_48, %c0_49, %c0_50], %45 {strides = array<i32>} : memref<1x4x2x512xf32, #tpu.memory_space<vmem>>, vector<1x1x2x512xf32>,
    %c0_51 = arith.constant 0 : index
    %c3_52 = arith.constant 3 : index
    %c0_53 = arith.constant 0 : index
    %c0_54 = arith.constant 0 : index
    %46 = vector.load %arg2[%c0_51, %c3_52, %c0_53, %c0_54] : memref<1x4x2x512xf32, #tpu.memory_space<vmem>>, vector<1x1x2x512xf32>
    %47 = vector.shape_cast %46 : vector<1x1x2x512xf32> to vector<2x512xf32>
    %cst_55 = arith.constant 0.000000e+00 : f32
    %48 = vector.broadcast %cst_55 : f32 to vector<2x512xf32>
    %49 = arith.select %24, %47, %48 : vector<2x512xi1>, vector<2x512xf32>
    %c0_56 = arith.constant 0 : index
    %c3_57 = arith.constant 3 : index
    %c0_58 = arith.constant 0 : index
    %c0_59 = arith.constant 0 : index
    %50 = vector.load %arg4[%c0_56, %c3_57, %c0_58, %c0_59] : memref<1x4x2x512xf32, #tpu.memory_space<vmem>>, vector<1x1x2x512xf32>
    %51 = vector.shape_cast %50 : vector<1x1x2x512xf32> to vector<2x512xf32>
    %52 = vector.shape_cast %49 : vector<2x512xf32> to vector<1x1x2x512xf32>
    tpu.vector_store %arg4[%c0_56, %c3_57, %c0_58, %c0_59], %52 {strides = array<i32>} : memref<1x4x2x512xf32, #tpu.memory_space<vmem>>, vector<1x1x2x512xf32>,
    return
  }
  func.func @transform_0(%arg0: i32, %arg1: i32) -> (i32, i32, i32, i32) {
    %c0_i32 = arith.constant 0 : i32
    %c0_i32_0 = arith.constant 0 : i32
    %c0_i32_1 = arith.constant 0 : i32
    return %arg1, %c0_i32, %arg0, %c0_i32_0 : i32, i32, i32, i32
  }
  func.func @transform_1(%arg0: i32, %arg1: i32) -> (i32, i32, i32) {
    %c0_i32 = arith.constant 0 : i32
    %c0_i32_0 = arith.constant 0 : i32
    %c0_i32_1 = arith.constant 0 : i32
    return %c0_i32, %arg0, %c0_i32_0 : i32, i32, i32
  }
  func.func @transform_2(%arg0: i32, %arg1: i32) -> (i32, i32, i32, i32) {
    %c0_i32 = arith.constant 0 : i32
    %c0_i32_0 = arith.constant 0 : i32
    %c0_i32_1 = arith.constant 0 : i32
    return %arg1, %c0_i32, %arg0, %c0_i32_0 : i32, i32, i32, i32
  }
}

</mosaic_0001>

<bundles_post_ra>
// kernel: ctrelu_forward.1
= control target key start
LH: loop header
LB: loop body
LE: loop exit
PB: predicated region body
PF: predicated region fallthrough
CT: control target
= control target key end

     0   :  { %s433_s9 = smov 0   ;;  %s435_s10 = smov 0   ;;  %s478_s0 = inlined_call_operand.vmem [shape: f32[2,4,2,512], index: 0, kind: input, shape index: {}]   ;;  %s479_s1 = inlined_call_operand.vmem [shape: f32[4,2,512], index: 1, kind: input, shape index: {}]   ;;  %s480_s2 = inlined_call_operand.vmem [shape: f32[2,4,2,512], index: 2, kind: output, shape index: {}]  }
   0x1   :  { %s437_s11 = smov 0  }
   0x2 LB: > { %s21_s12 = sadd.s32 1, %s412_s10  ;;  %p349_p0 = scmp.ge.s32.totalorder %s416_s11, 1  ;;  %s416_s11 = sphi %s437_s11, %s12_s11   ;;  %s412_s10 = sphi %s435_s10, %s482_s10   ;;  %s408_s9 = sphi %s433_s9, %s481_s9  }
   0x3   : > { %p22_p1 = scmp.ge.s32.totalorder %s21_s12, 2  ;;  %p142_p2 = scmp.lt.s32.totalorder %s416_s11, 3 }
   0x5   : > { %s484_s12 = smov (%p22_p1, %s21_s12), 0  ;;  %p143_p3 = pnand %p349_p0, %p142_p2 }
   0x6   : > { %p177_p4 = scmp.lt.s32.totalorder (!%p143_p3), %s408_s9, 1  ;;  %v201_v0 = vld [vmem:[%s479_s1] sm:$0xff] (!%p143_p3)  ;;  %v355_v1 = vld [vmem:[%s479_s1 + $0x8] sm:$0xff] (!%p143_p3)  ;;  %v357_v2 = vld [vmem:[%s479_s1 + $0x10] sm:$0xff] (!%p143_p3) }
   0x7   : > { %146 = sbr.rel (%p143_p3) target bundleno = 30 (0x1e), region = 28  ;;  %v359_v3 = vld [vmem:[%s479_s1 + $0x18] sm:$0xff] (!%p143_p3) }
   0xe   : > { %s486_s9 = smov (!%p177_p4, %s408_s9), 1 }
   0xf   : > { %s368_s13 = sshll.u32 %s486_s9, 5 }
  0x10   : > { %s185_s22 = scalar_lea.vmem %s478_s0, %s368_s13  ;;  %s199_s27 = scalar_lea.vmem %s480_s2, %s368_s13 }
  0x11   : > { %v200_v4 = vld [vmem:[%s185_s22] sm:$0xff]  ;;  %v354_v5 = vld [vmem:[%s185_s22 + $0x8] sm:$0xff]  ;;  %v356_v6 = vld [vmem:[%s185_s22 + $0x10] sm:$0xff] }
  0x12   : > { %v202_v7 = vmul.f32 %v201_v0, %v200_v4  ;;  %v207_v8 = vmul.f32 %v355_v1, %v354_v5  ;;  %v213_v9 = vmul.f32 %v357_v2, %v356_v6  ;;  %v358_v10 = vld [vmem:[%s185_s22 + $0x18] sm:$0xff] }
  0x13   : > { %v219_v12 = vmul.f32 %v359_v3, %v358_v10 }
  0x14   : > { %v208_v11 = vadd.f32 %v207_v8, %v202_v7 }
  0x16   : > { %v214_v13 = vadd.f32 %v213_v9, %v208_v11 }
  0x18   : > { %v220_v14 = vadd.f32 %v219_v12, %v214_v13 }
  0x1a   : > { %vm221_vm0 = vcmp.ge.f32.partialorder %v220_v14, 0.0 }
  0x1b   : > { %v222_v15 = vsel %vm221_vm0, %v200_v4, 0.0  ;;  %v225_v16 = vsel %vm221_vm0, %v354_v5, 0.0  ;;  %v229_v17 = vsel %vm221_vm0, %v356_v6, 0.0  ;;  %v233_v18 = vsel %vm221_vm0, %v358_v10, 0.0 }
  0x1c   : > { %223 = vst [vmem:[%s199_s27] sm:$0xff] %v222_v15  ;;  %361 = vst [vmem:[%s199_s27 + $0x8] sm:$0xff] %v225_v16 }
  0x1d   : > { %363 = vst [vmem:[%s199_s27 + $0x10] sm:$0xff] %v229_v17  ;;  %365 = vst [vmem:[%s199_s27 + $0x18] sm:$0xff] %v233_v18 }
  0x1e PF: > { %s12_s11 = sadd.s32 1, %s416_s11   ;;  %s481_s9 = smov %s412_s10 }
  0x1f   : > { %p9_p5 = scmp.ge.s32.totalorder %s12_s11, 4   ;;  %s482_s10 = smov %s484_s12 }
  0x21   :  { %11 = sbr.rel (!%p9_p5) target bundleno = 2 (0x2), region = 70 }

</bundles_post_ra>
